<compile_context>
chip_gen: v7x
topology: tpu7x:2x2x1
jax: 0.10.0
libtpu: 0.0.40
codegen_flags: <defaults>
</compile_context>

<pallas_src>
import functools

import jax
import jax.numpy as jnp
from jax.experimental import pallas as pl
from jax.experimental.pallas import tpu as pltpu

_LANE = 128


def _round_up(x: int, m: int) -> int:
    return (x + m - 1) // m * m


# ----------------------------------------------------------------------------
# Pallas kernel: per-(batch, spatial-tile) cross-entropy partial sums
# ----------------------------------------------------------------------------
def _ce2d_kernel(*refs, ignore_label, hw, tile, chunk, has_weight):
    """Refs (has_weight=True):
         x_ref  : (C, tile)  logits, native dtype (classes on sublanes)
         t_ref  : (1, tile)  int32 targets
         w_ref  : (C, 1)     f32 per-class weights
         out_ref: (1, 128)   f32;  lane 0 = sum_i w[y_i]*(lse_i - x_i[y_i]),
                                   lane 1 = sum_i w[y_i]
       has_weight=False drops w_ref and uses weight 1.0 for valid pixels.
    """
    if has_weight:
        x_ref, t_ref, w_ref, out_ref = refs
        wv = w_ref[...]                                   # (C, 1) f32, hoisted
    else:
        x_ref, t_ref, out_ref = refs
        wv = None

    C = x_ref.shape[0]
    j = pl.program_id(1)
    base = j * tile                                       # tile start in [0, hw)
    n_chunks = tile // chunk

    def body(ci, carry):
        loss_lanes, wsum_lanes = carry                    # (1, chunk) f32 each
        start = pl.multiple_of(ci * chunk, chunk)

        x = x_ref[:, pl.ds(start, chunk)].astype(jnp.float32)   # (C, chunk)
        tgt = t_ref[:, pl.ds(start, chunk)]                     # (1, chunk) int32

        lane = jax.lax.broadcasted_iota(jnp.int32, (1, chunk), 1)
        in_bounds = (base + start + lane) < hw                  # (1, chunk)
        valid = jnp.logical_and(
            in_bounds, jnp.logical_and(tgt >= 0, tgt != ignore_label))

        # OOB tail lanes hold undefined bits (possibly NaN/inf): select them
        # away before any math -- never rely on multiply-by-zero.
        x = jnp.where(in_bounds, x, 0.0)                        # (C, chunk)

        cls = jax.lax.broadcasted_iota(jnp.int32, (C, chunk), 0)
        onehot = cls == tgt                                     # bool (C, chunk)

        # stable log-sum-exp over the class/sublane axis
        m = jnp.max(x, axis=0, keepdims=True)                            # (1,chunk)
        lse = m + jnp.log(jnp.sum(jnp.exp(x - m), axis=0, keepdims=True))
        picked = jnp.sum(jnp.where(onehot, x, 0.0), axis=0, keepdims=True)

        if has_weight:
            w_t = jnp.sum(jnp.where(onehot, wv, 0.0), axis=0, keepdims=True)
            vw = jnp.where(valid, w_t, 0.0)
        else:
            # sum(onehot) == 1 for any in-range valid target, so the weight is
            # just the validity mask.
            # TODO(synk): targets >= C that are not ignore_label are undefined
            # behaviour (PyTorch raises); here they contribute lse with weight 1.
            vw = valid.astype(jnp.float32)

        return (loss_lanes + vw * (lse - picked), wsum_lanes + vw)

    zeros = jnp.zeros((1, chunk), jnp.float32)
    loss_lanes, wsum_lanes = jax.lax.fori_loop(0, n_chunks, body, (zeros, zeros))

    ls = jnp.sum(loss_lanes, axis=1, keepdims=True)       # (1, 1)
    ws = jnp.sum(wsum_lanes, axis=1, keepdims=True)       # (1, 1)
    out_lane = jax.lax.broadcasted_iota(jnp.int32, (1, _LANE), 1)
    out_ref[...] = jnp.where(out_lane == 0, ls, jnp.where(out_lane == 1, ws, 0.0))


# ----------------------------------------------------------------------------
# Wrapper: CrossEntropy2d.forward(predict, target, weight)
# ----------------------------------------------------------------------------
def cross_entropy_2d(predict, target, weight=None, *, size_average=True,
                     ignore_label=255, tile_cap=16384, chunk=1024):
    """predict: (n, c, h, w) logits (any float dtype); target: (n, h, w) ints.
    Returns a scalar f32 loss. Pixels with target < 0 or == ignore_label are
    excluded; `weight` is an optional per-class rescaling vector of size c.
    """
    n, c, h, w = predict.shape
    hw = h * w

    hw128 = _round_up(hw, _LANE)
    if hw128 <= chunk:
        tile = hw128
        chunk = hw128
    else:
        tile = min(_round_up(hw128, chunk), _round_up(tile_cap, chunk))
    n_tiles = pl.cdiv(hw, tile)

    # Native dtype, no cast, no spatial padding (ragged tail masked in-kernel).
    x = predict.reshape(n, c, hw)
    t = target.astype(jnp.int32).reshape(n, 1, hw)

    has_weight = weight is not None
    kernel = functools.partial(_ce2d_kernel, ignore_label=ignore_label, hw=hw,
                               tile=tile, chunk=chunk, has_weight=has_weight)

    in_specs = [
        # logits: classes on sublanes, pixels on lanes.
        # (If xprof ever shows exposed DMA on this block, add
        #  pipeline_mode=pl.Buffered(3).)
        pl.BlockSpec((None, c, tile), lambda i, j: (i, 0, j)),
        pl.BlockSpec((None, 1, tile), lambda i, j: (i, 0, j)),   # targets
    ]
    args = [x, t]
    if has_weight:
        in_specs.append(pl.BlockSpec((c, 1), lambda i, j: (0, 0)))
        args.append(weight.astype(jnp.float32).reshape(c, 1))

    out = pl.pallas_call(
        kernel,
        out_shape=jax.ShapeDtypeStruct((n, n_tiles, 1, _LANE), jnp.float32),
        grid_spec=pltpu.PrefetchScalarGridSpec(
            num_scalar_prefetch=0,
            grid=(n, n_tiles),
            in_specs=in_specs,
            out_specs=pl.BlockSpec((None, None, 1, _LANE),
                                   lambda i, j: (i, j, 0, 0)),
        ),
        compiler_params=pltpu.CompilerParams(
            dimension_semantics=("parallel", "parallel"),
            vmem_limit_bytes=32 * 1024 * 1024,
        ),
    )(*args)

    loss_sum = jnp.sum(out[:, :, 0, 0])
    weight_sum = jnp.sum(out[:, :, 0, 1])
    if size_average:
        # TODO(synk): torch returns torch.zeros(1) (shape (1,)) when every
        # pixel is ignored; we return a 0-d scalar 0.0 in that case.
        return jnp.where(weight_sum > 0,
                         loss_sum / jnp.maximum(weight_sum, 1e-12), 0.0)
    return jnp.where(weight_sum > 0, loss_sum, 0.0)


# ----------------------------------------------------------------------------
# Pure-JAX reference (mirrors F.cross_entropy with masking) for validation
# ----------------------------------------------------------------------------
def _reference_ce2d(predict, target, weight=None, size_average=True,
                    ignore_label=255):
    n, c, h, w = predict.shape
    logits = jnp.transpose(predict, (0, 2, 3, 1)).reshape(-1, c).astype(jnp.float32)
    tgt = target.reshape(-1)
    valid = jnp.logical_and(tgt >= 0, tgt != ignore_label)
    tgt_c = jnp.clip(tgt, 0, c - 1)
    logp = jax.nn.log_softmax(logits, axis=-1)
    picked = jnp.take_along_axis(logp, tgt_c[:, None], axis=-1)[:, 0]
    wv = jnp.ones((c,), jnp.float32) if weight is None else weight.astype(jnp.float32)
    wt = wv[tgt_c]
    lsum = jnp.sum(jnp.where(valid, -picked * wt, 0.0))
    wsum = jnp.sum(jnp.where(valid, wt, 0.0))
    if size_average:
        return jnp.where(wsum > 0, lsum / jnp.maximum(wsum, 1e-12), 0.0)
    return jnp.where(wsum > 0, lsum, 0.0)


if __name__ == "__main__":
    IGNORE = 255
    key = jax.random.PRNGKey(0)

    def make_case(case_key, n, c, h, w, dtype):
        k1, k2, k3, k4 = jax.random.split(case_key, 4)
        predict = jax.random.normal(k1, (n, c, h, w), jnp.float32).astype(dtype)
        target = jax.random.randint(k2, (n, h, w), 0, c, jnp.int32)
        target = jnp.where(jax.random.uniform(k3, (n, h, w)) < 0.15, IGNORE, target)
        class_weight = jax.random.uniform(k4, (c,), jnp.float32, 0.5, 1.5)
        return predict, target, class_weight

    # (n, c, h, w, logits dtype) -- exercises aligned, ragged-tail, multi-chunk
    # and multi-tile paths, plus the native-bf16 streaming path.
    cases = [
        (2, 21, 16, 16, jnp.float32),     # hw = 256, single chunk
        (1, 21, 17, 23, jnp.bfloat16),    # hw = 391, ragged tail, bf16 logits
        (1, 21, 40, 65, jnp.float32),     # hw = 2600, multi-chunk inner loop
        (1, 21, 130, 130, jnp.bfloat16),  # hw = 16900, multi-tile grid + tail
    ]

    ce = jax.jit(functools.partial(cross_entropy_2d,
                                   size_average=True, ignore_label=IGNORE))

    keys = jax.random.split(key, len(cases))
    for case_key, (n, c, h, w, dtype) in zip(keys, cases):
        predict, target, class_weight = make_case(case_key, n, c, h, w, dtype)
        for wt in (None, class_weight):
            got = ce(predict, target, wt)
            jax.block_until_ready(got)
            ref = _reference_ce2d(predict, target, wt, True, IGNORE)
            assert jnp.allclose(got, ref, rtol=1e-4, atol=1e-5), \
                (n, c, h, w, str(dtype), wt is not None, got, ref)

    print("KERNEL_OK")
</pallas_src>

<mosaic_0001>
module attributes {stable_mosaic.version = 11 : i64} {
  func.func @_ce2d_kernel(%arg0: i32, %arg1: i32, %arg2: memref<1x21x256xf32, #tpu.memory_space<vmem>>, %arg3: memref<1x1x256xi32, #tpu.memory_space<vmem>>, %arg4: memref<1x1x1x128xf32, #tpu.memory_space<vmem>>) attributes {dimension_semantics = [#tpu.dimension_semantics<parallel>, #tpu.dimension_semantics<parallel>], iteration_bounds = array<i64: 2, 1>, scalar_prefetch = 0 : i64, scratch_operands = 0 : i64, tpu.core_type = #tpu.core_type<tc>, window_params = [{transform_indices = @transform_0, window_bounds = array<i64: 1, 21, 256>}, {transform_indices = @transform_1, window_bounds = array<i64: 1, 1, 256>}, {transform_indices = @transform_2, window_bounds = array<i64: 1, 1, 1, 128>}]} {
    %c256_i32 = arith.constant 256 : i32
    %0 = arith.muli %arg1, %c256_i32 : i32
    %cst = arith.constant 0.000000e+00 : f32
    %1 = vector.broadcast %cst : f32 to vector<1x256xf32>
    %c0_i32 = arith.constant 0 : i32
    %c256_i32_0 = arith.constant 256 : i32
    %2 = arith.muli %c0_i32, %c256_i32_0 : i32
    %3 = tpu.assume_multiple %2, 256 : i32
    %c0 = arith.constant 0 : index
    %c0_1 = arith.constant 0 : index
    %4 = arith.index_cast %3 : i32 to index
    %5 = vector.load %arg2[%c0, %c0_1, %4] : memref<1x21x256xf32, #tpu.memory_space<vmem>>, vector<1x21x256xf32>
    %6 = vector.shape_cast %5 : vector<1x21x256xf32> to vector<21x256xf32>
    %c0_2 = arith.constant 0 : index
    %c0_3 = arith.constant 0 : index
    %7 = arith.index_cast %3 : i32 to index
    %8 = vector.load %arg3[%c0_2, %c0_3, %7] : memref<1x1x256xi32, #tpu.memory_space<vmem>>, vector<1x1x256xi32>
    %9 = vector.shape_cast %8 : vector<1x1x256xi32> to vector<1x256xi32>
    %10 = tpu.iota {dimensions = array<i32: 1>} : vector<1x256xi32>
    %11 = arith.addi %0, %3 : i32
    %12 = vector.broadcast %11 : i32 to vector<1x256xi32>
    %13 = arith.addi %12, %10 : vector<1x256xi32>
    %c256_i32_4 = arith.constant 256 : i32
    %14 = vector.broadcast %c256_i32_4 : i32 to vector<1x256xi32>
    %15 = arith.cmpi slt, %13, %14 : vector<1x256xi32>
    %c0_i32_5 = arith.constant 0 : i32
    %16 = vector.broadcast %c0_i32_5 : i32 to vector<1x256xi32>
    %17 = arith.cmpi sge, %9, %16 : vector<1x256xi32>
    %c255_i32 = arith.constant 255 : i32
    %18 = vector.broadcast %c255_i32 : i32 to vector<1x256xi32>
    %19 = arith.cmpi ne, %9, %18 : vector<1x256xi32>
    %20 = arith.andi %17, %19 : vector<1x256xi1>
    %21 = arith.andi %15, %20 : vector<1x256xi1>
    %cst_6 = arith.constant 0.000000e+00 : f32
    %22 = vector.shape_cast %15 : vector<1x256xi1> to vector<1x256xi1>
    %23 = vector.broadcast %22 : vector<1x256xi1> to vector<21x256xi1>
    %24 = vector.broadcast %cst_6 : f32 to vector<21x256xf32>
    %25 = arith.select %23, %6, %24 : vector<21x256xi1>, vector<21x256xf32>
    %26 = tpu.iota {dimensions = array<i32: 0>} : vector<21x256xi32>
    %27 = vector.broadcast %9 : vector<1x256xi32> to vector<21x256xi32>
    %28 = arith.cmpi eq, %26, %27 : vector<21x256xi32>
    %cst_7 = arith.constant dense<0xFF800000> : vector<256xf32>
    %29 = vector.multi_reduction <maximumf>, %25, %cst_7 [0] : vector<21x256xf32> to vector<256xf32>
    %30 = vector.shape_cast %29 : vector<256xf32> to vector<1x256xf32>
    %31 = vector.broadcast %30 : vector<1x256xf32> to vector<21x256xf32>
    %32 = arith.subf %25, %31 : vector<21x256xf32>
    %33 = math.exp %32 : vector<21x256xf32>
    %cst_8 = arith.constant dense<0.000000e+00> : vector<256xf32>
    %34 = vector.multi_reduction <add>, %33, %cst_8 [0] : vector<21x256xf32> to vector<256xf32>
    %35 = vector.shape_cast %34 : vector<256xf32> to vector<1x256xf32>
    %36 = math.log %35 : vector<1x256xf32>
    %37 = arith.addf %30, %36 : vector<1x256xf32>
    %cst_9 = arith.constant 0.000000e+00 : f32
    %38 = vector.broadcast %cst_9 : f32 to vector<21x256xf32>
    %39 = arith.select %28, %25, %38 : vector<21x256xi1>, vector<21x256xf32>
    %cst_10 = arith.constant dense<0.000000e+00> : vector<256xf32>
    %40 = vector.multi_reduction <add>, %39, %cst_10 [0] : vector<21x256xf32> to vector<256xf32>
    %41 = vector.shape_cast %40 : vector<256xf32> to vector<1x256xf32>
    %42 = arith.extui %21 : vector<1x256xi1> to vector<1x256xi32>
    %43 = arith.sitofp %42 : vector<1x256xi32> to vector<1x256xf32>
    %44 = arith.subf %37, %41 : vector<1x256xf32>
    %45 = arith.mulf %43, %44 : vector<1x256xf32>
    %46 = arith.addf %1, %45 : vector<1x256xf32>
    %47 = arith.addf %1, %43 : vector<1x256xf32>
    %c1_i32 = arith.constant 1 : i32
    %cst_11 = arith.constant dense<0.000000e+00> : vector<1xf32>
    %48 = vector.multi_reduction <add>, %46, %cst_11 [1] : vector<1x256xf32> to vector<1xf32>
    %49 = vector.shape_cast %48 : vector<1xf32> to vector<1x1xf32>
    %cst_12 = arith.constant dense<0.000000e+00> : vector<1xf32>
    %50 = vector.multi_reduction <add>, %47, %cst_12 [1] : vector<1x256xf32> to vector<1xf32>
    %51 = vector.shape_cast %50 : vector<1xf32> to vector<1x1xf32>
    %52 = tpu.iota {dimensions = array<i32: 1>} : vector<1x128xi32>
    %c0_i32_13 = arith.constant 0 : i32
    %53 = vector.broadcast %c0_i32_13 : i32 to vector<1x128xi32>
    %54 = arith.cmpi eq, %52, %53 : vector<1x128xi32>
    %c1_i32_14 = arith.constant 1 : i32
    %55 = vector.broadcast %c1_i32_14 : i32 to vector<1x128xi32>
    %56 = arith.cmpi eq, %52, %55 : vector<1x128xi32>
    %cst_15 = arith.constant 0.000000e+00 : f32
    %57 = vector.shape_cast %51 : vector<1x1xf32> to vector<1x1xf32>
    %58 = vector.broadcast %57 : vector<1x1xf32> to vector<1x128xf32>
    %59 = vector.broadcast %cst_15 : f32 to vector<1x128xf32>
    %60 = arith.select %56, %58, %59 : vector<1x128xi1>, vector<1x128xf32>
    %61 = vector.shape_cast %49 : vector<1x1xf32> to vector<1x1xf32>
    %62 = vector.broadcast %61 : vector<1x1xf32> to vector<1x128xf32>
    %63 = arith.select %54, %62, %60 : vector<1x128xi1>, vector<1x128xf32>
    %c0_16 = arith.constant 0 : index
    %c0_17 = arith.constant 0 : index
    %c0_18 = arith.constant 0 : index
    %c0_19 = arith.constant 0 : index
    %64 = vector.load %arg4[%c0_16, %c0_17, %c0_18, %c0_19] : memref<1x1x1x128xf32, #tpu.memory_space<vmem>>, vector<1x1x1x128xf32>
    %65 = vector.shape_cast %64 : vector<1x1x1x128xf32> to vector<1x128xf32>
    %66 = vector.shape_cast %63 : vector<1x128xf32> to vector<1x1x1x128xf32>
    tpu.vector_store %arg4[%c0_16, %c0_17, %c0_18, %c0_19], %66 {strides = array<i32>} : memref<1x1x1x128xf32, #tpu.memory_space<vmem>>, vector<1x1x1x128xf32>,
    return
  }
  func.func @transform_0(%arg0: i32, %arg1: i32) -> (i32, i32, i32) {
    %c0_i32 = arith.constant 0 : i32
    %c0_i32_0 = arith.constant 0 : i32
    return %arg0, %c0_i32, %arg1 : i32, i32, i32
  }
  func.func @transform_1(%arg0: i32, %arg1: i32) -> (i32, i32, i32) {
    %c0_i32 = arith.constant 0 : i32
    %c0_i32_0 = arith.constant 0 : i32
    return %arg0, %c0_i32, %arg1 : i32, i32, i32
  }
  func.func @transform_2(%arg0: i32, %arg1: i32) -> (i32, i32, i32, i32) {
    %c0_i32 = arith.constant 0 : i32
    %c0_i32_0 = arith.constant 0 : i32
    %c0_i32_1 = arith.constant 0 : i32
    return %arg0, %arg1, %c0_i32, %c0_i32_0 : i32, i32, i32, i32
  }
}

</mosaic_0001>

<bundles_post_ra>
// kernel: cross_entropy_2d.1
= control target key start
LH: loop header
LB: loop body
LE: loop exit
PB: predicated region body
PF: predicated region fallthrough
CT: control target
= control target key end

     0   :  { %s564_s9 = smov 0   ;;  %s566_s10 = smov 0   ;;  %s671_s0 = inlined_call_operand.vmem [shape: f32[2,21,256], index: 0, kind: input, shape index: {}]   ;;  %s672_s1 = inlined_call_operand.vmem [shape: s32[2,1,256], index: 1, kind: input, shape index: {}]   ;;  %s673_s2 = inlined_call_operand.vmem [shape: f32[2,1,1,128], index: 2, kind: output, shape index: {}]  }
   0x1   :  { %s568_s11 = smov 0  }
   0x2 LB: > { %s24_s12 = sadd.s32 1, %s541_s10  ;;  %p473_p0 = scmp.ge.s32.totalorder %s545_s11, 1  ;;  %s545_s11 = sphi %s568_s11, %s12_s11   ;;  %s541_s10 = sphi %s566_s10, %s675_s10   ;;  %s537_s9 = sphi %s564_s9, %s674_s9  }
   0x3   : > { %p26_p1 = scmp.ge.s32.totalorder %s24_s12, 2  ;;  %p149_p2 = scmp.lt.s32.totalorder %s545_s11, 3 }
   0x5   : > { %s677_s12 = smov (%p26_p1, %s24_s12), 0  ;;  %p150_p3 = pnand %p473_p0, %p149_p2 }
   0x6   : > { %p185_p4 = scmp.lt.s32.totalorder (!%p150_p3), %s537_s9, 1  ;;  %v217_v0 = vlaneseq (!%p150_p3)  ;;  %vm270_vm3 = vcmask (!%p150_p3), 1044480   ;;  %v547_v6 = vmov (!%p150_p3), 0   ;;  %vm367_vm4 = vcmask (!%p150_p3), 1040384  }
   0x7   : > { %153 = sbr.rel (%p150_p3) target bundleno = 237 (0xed), region = 28  ;;  %v548_v19 = vmov (!%p150_p3), 0.0  }
   0x8   : > { %v586_v1 = vshrl.u32 (!%p150_p3), %v217_v0, 7 }
   0xa   : > { %v232_v3 = vsub.s32 (!%p150_p3), 0, %v586_v1  ;;  %v236_v4 = vsub.s32 (!%p150_p3), 1, %v586_v1  ;;  %v254_v51 = vadd.s32 (!%p150_p3), 8, %v586_v1  ;;  %v255_v53 = vadd.s32 (!%p150_p3), 16, %v586_v1 }
   0xe   : > { %s679_s9 = smov (!%p185_p4, %s537_s9), 1 }
   0xf   : > { %s475_s13 = sshll.u32 %s679_s9, 1  ;;  %s480_s14 = smul.u32 48, %s679_s9 }
  0x10   : > { %s201_s17 = scalar_lea.vmem %s672_s1, %s475_s13  ;;  %s208_s23 = scalar_lea.vmem %s673_s2, %s679_s9 }
  0x11   : > { %v592_v2 = vld [vmem:[%s201_s17] sm:$0x3]  ;;  %s192_s20 = scalar_lea.vmem %s671_s0, %s480_s14 }
  0x12   : > { %vm226_vm0 = vcmp.ge.s32.totalorder %v592_v2, 0  ;;  %vm227_vm1 = vcmp.ne.s32.totalorder %v592_v2, 255  ;;  %v601_v5 = vld [vmem:[%s192_s20 + $0x20] sm:$0x1f]  ;;  %v605_v9 = vld [vmem:[%s192_s20 + $0x8] sm:$0xff]  ;;  %v212_v13 = vld [vmem:[%s192_s20 + $0x10] sm:$0xff]  ;;  %v259_v52 = vrot.slane %v592_v2, %v232_v3  ;;  %v263_v54 = vrot.slane %v592_v2, %v236_v4 }
  0x13   : > { %vm228_vm2 = vmand %vm226_vm0, %vm227_vm1  ;;  %v603_v8 = vld [vmem:[%s192_s20] sm:$0xff]  ;;  %v607_v10 = vld [vmem:[%s192_s20 + $0x28] sm:$0x1f]  ;;  %v271_v15 = vsel %vm270_vm3, %v601_v5, -inf }
  0x14   : > { %v229_v7 = vsel %vm228_vm2, 1, %v547_v6  ;;  %v213_v14 = vld [vmem:[%s192_s20 + $0x18] sm:$0xff]  ;;  %v280_v16 = vsel %vm270_vm3, %v607_v10, -inf  ;;  %v272_v17 = vmax.f32 %v603_v8, %v271_v15  ;;  %vm264_vm7 = vcmp.eq.s32.totalorder %v586_v1, %v259_v52 }
  0x15   : > { %v233_v11 = vrot.slane %v229_v7, %v232_v3  ;;  %v237_v12 = vrot.slane %v229_v7, %v236_v4  ;;  %v281_v18 = vmax.f32 %v605_v9, %v280_v16  ;;  %vm266_vm8 = vcmp.eq.s32.totalorder %v254_v51, %v259_v52 }
  0x16   : > { %v273_v24 = vmax.f32 %v272_v17, %v212_v13  ;;  %vm265_vm9 = vcmp.eq.s32.totalorder %v586_v1, %v263_v54  ;;  %vm267_vm10 = vcmp.eq.s32.totalorder %v254_v51, %v263_v54  ;;  %vm268_vm11 = vcmp.eq.s32.totalorder %v255_v53, %v259_v52 }
  0x17   : > { %vm238_vm5 = vcmp.ne.s32.totalorder %v233_v11, 0  ;;  %vm239_vm6 = vcmp.ne.s32.totalorder %v237_v12, 0  ;;  %v282_v25 = vmax.f32 %v281_v18, %v213_v14  ;;  %vm269_vm12 = vcmp.eq.s32.totalorder %v255_v53, %v263_v54 }
  0x18   : > { %v615_v20 = vsel %vm238_vm5, 1.0, %v548_v19  ;;  %v617_v21 = vsel %vm239_vm6, 1.0, %v548_v19  ;;  %v274_v27 = vrot.slane %v273_v24, 4  ;;  %v331_v56 = vsel %vm264_vm7, %v603_v8, 0.0 }
  0x19   : > { %v373_v22 = vsel %vm367_vm4, %v615_v20, 0.0  ;;  %v374_v23 = vsel %vm367_vm4, %v617_v21, 0.0  ;;  %v283_v28 = vrot.slane %v282_v25, 4  ;;  %v333_v57 = vsel %vm266_vm8, %v212_v13, 0.0 }
  0x1a   : > { %v375_v26 = vadd.f32 %v374_v23, %v373_v22  ;;  %v275_v29 = vmax.f32 %v273_v24, %v274_v27  ;;  %v332_v59 = vsel %vm265_vm9, %v605_v9, 0.0  ;;  %v334_v60 = vsel %vm267_vm10, %v213_v14, 0.0 }
  0x1b   : > { %v284_v30 = vmax.f32 %v282_v25, %v283_v28  ;;  %v335_v61 = vsel %vm268_vm11, %v601_v5, 0.0  ;;  %v336_v63 = vsel %vm269_vm12, %v607_v10, 0.0  ;;  %v337_v4 = vadd.f32 %v333_v57, %v331_v56 }
  0x1c   : > { %376 = vadd.xlane.f32.xlu0 %v375_v26  ;;  %v276_v31 = vrot.slane %v275_v29, 2  ;;  %v338_v7 = vsel %vm270_vm3, %v335_v61, 0.0  ;;  %v346_v11 = vadd.f32 %v334_v60, %v332_v59  ;;  %v218_v57 = vand.u32 127, %v217_v0 }
  0x1d   : > { %v285_v32 = vrot.slane %v284_v30, 2  ;;  %v339_v15 = vadd.f32 %v338_v7, %v337_v4 }
  0x1e   : > { %v277_v33 = vmax.f32 %v275_v29, %v276_v31  ;;  %vm379_vm13 = vcmp.eq.s32.totalorder %v218_v57, 1  ;;  %vm378_vm14 = vcmp.eq.s32.totalorder %v218_v57, 0 }
  0x1f   : > { %v286_v34 = vmax.f32 %v284_v30, %v285_v32  ;;  %v340_v22 = vrot.slane %v339_v15, 4 }
  0x20   : > { %v278_v35 = vrot.slane %v277_v33, 1 }
  0x21   : > { %v287_v36 = vrot.slane %v286_v34, 1  ;;  %v341_v28 = vadd.f32 %v340_v22, %v339_v15 }
  0x22   : > { %v623_v37 = vmax.f32 %v277_v33, %v278_v35 }
  0x23   : > { %v625_v38 = vmax.f32 %v286_v34, %v287_v36  ;;  %v342_v34 = vrot.slane %v341_v28, 2 }
  0x24   : > { %v289_v39 = vsub.f32 %v603_v8, %v623_v37  ;;  %v291_v41 = vsub.f32 %v212_v13, %v623_v37  ;;  %v293_v43 = vsub.f32 %v601_v5, %v623_v37  ;;  %v347_v13 = vsel %vm270_vm3, %v336_v63, 0.0 }
  0x25   : > { %v290_v40 = vsub.f32 %v605_v9, %v625_v38  ;;  %v292_v42 = vsub.f32 %v213_v14, %v625_v38  ;;  %v294_v44 = vsub.f32 %v607_v10, %v625_v38  ;;  %v348_v10 = vadd.f32 %v347_v13, %v346_v11 }
  0x26   : > { %v295_v45 = vmul.f32 1.442695, %v289_v39  ;;  %v299_v47 = vmul.f32 1.442695, %v291_v41  ;;  %v303_v49 = vmul.f32 1.442695, %v293_v43  ;;  %v343_v36 = vadd.f32 %v342_v34, %v341_v28 }
  0x27   : > { %v297_v46 = vmul.f32 1.442695, %v290_v40  ;;  %v301_v48 = vmul.f32 1.442695, %v292_v42  ;;  %v305_v50 = vmul.f32 1.442695, %v294_v44 }
  0x28   : > { %507 = vpow2.f32 %v295_v45  ;;  %v349_v24 = vrot.slane %v348_v10, 4  ;;  %v344_v40 = vrot.slane %v343_v36, 1 }
  0x29   : > { %509 = vpow2.f32 %v297_v46 }
  0x2a   : > { %511 = vpow2.f32 %v299_v47  ;;  %v350_v30 = vadd.f32 %v349_v24, %v348_v10  ;;  %v345_v45 = vadd.f32 %v344_v40, %v343_v36 }
  0x2b   : > { %513 = vpow2.f32 %v301_v48 }
  0x2c   : > { %515 = vpow2.f32 %v303_v49  ;;  %v351_v35 = vrot.slane %v350_v30, 2 }
  0x2d   : > { %517 = vpow2.f32 %v305_v50 }
  0x2e   : > { %v352_v39 = vadd.f32 %v351_v35, %v350_v30 }
  0x30   : > { %v353_v41 = vrot.slane %v352_v39, 1 }
  0x32   : > { %v508_v55 = vpop.eup %507  ;;  %v354_v47 = vadd.f32 %v353_v41, %v352_v39 }
  0x33   : > { %v510_v58 = vpop.eup %509 }
  0x34   : > { %v512_v62 = vpop.eup %511 }
  0x35   : > { %v514_v2 = vpop.eup %513  ;;  %v307_v3 = vadd.f32 %v512_v62, %v508_v55 }
  0x36   : > { %v516_v1 = vpop.eup %515  ;;  %v316_v6 = vadd.f32 %v514_v2, %v510_v58 }
  0x37   : > { %v518_v12 = vpop.eup %517  ;;  %v308_v8 = vsel %vm270_vm3, %v516_v1, 0.0 }
  0x38   : > { %v309_v9 = vadd.f32 %v308_v8, %v307_v3  ;;  %v317_v14 = vsel %vm270_vm3, %v518_v12, 0.0 }
  0x39   : > { %v318_v5 = vadd.f32 %v317_v14, %v316_v6 }
  0x3a   : > { %v310_v16 = vrot.slane %v309_v9, 4 }
  0x3b   : > { %v319_v17 = vrot.slane %v318_v5, 4 }
  0x3c   : > { %v311_v18 = vadd.f32 %v310_v16, %v309_v9 }
  0x3d   : > { %v320_v19 = vadd.f32 %v319_v17, %v318_v5 }
  0x3e   : > { %v312_v23 = vrot.slane %v311_v18, 2 }
  0x3f   : > { %v321_v25 = vrot.slane %v320_v19, 2 }
  0x40   : > { %v313_v26 = vadd.f32 %v312_v23, %v311_v18 }
  0x41   : > { %v322_v27 = vadd.f32 %v321_v25, %v320_v19 }
  0x42   : > { %v314_v29 = vrot.slane %v313_v26, 1 }
  0x43   : > { %v323_v31 = vrot.slane %v322_v27, 1 }
  0x44   : > { %v315_v32 = vadd.f32 %v314_v29, %v313_v26 }
  0x45   : > { %v324_v33 = vadd.f32 %v323_v31, %v322_v27 }
  0x46   : > { %519 = vlog2.f32 %v315_v32 }
  0x47   : > { %521 = vlog2.f32 %v324_v33 }
  0x50   : > { %v520_v42 = vpop.eup %519 }
  0x51   : > { %v522_v43 = vpop.eup %521  ;;  %v326_v44 = vmul.f32 0.6931472, %v520_v42 }
  0x52   : > { %v328_v46 = vmul.f32 0.6931472, %v522_v43 }
  0x53   : > { %v329_v48 = vadd.f32 %v326_v44, %v623_v37 }
  0x54   : > { %v330_v49 = vadd.f32 %v328_v46, %v625_v38 }
  0x55   : > { %v359_v50 = vsub.f32 %v329_v48, %v345_v45 }
  0x56   : > { %v360_v51 = vsub.f32 %v330_v49, %v354_v47 }
  0x57   : > { %v361_v52 = vmul.f32 %v615_v20, %v359_v50 }
  0x58   : > { %v362_v53 = vmul.f32 %v617_v21, %v360_v51 }
  0x59   : > { %v368_v54 = vsel %vm367_vm4, %v361_v52, 0.0 }
  0x5a   : > { %v369_v55 = vsel %vm367_vm4, %v362_v53, 0.0 }
  0x5b   : > { %v370_v56 = vadd.f32 %v369_v55, %v368_v54 }
  0x5d   : > { %371 = vadd.xlane.f32.xlu0 %v370_v56 }
  0xa9   : > { %v377_v58 = vpop.xlane.xlu0 %376 }
  0xaa   : > { %v380_v37 = vsel %vm379_vm13, %v377_v58, 0.0 }
  0xea   : > { %v372_v38 = vpop.xlane.xlu0 %371 }
  0xeb   : > { %v381_v20 = vsel %vm378_vm14, %v372_v38, %v380_v37 }
  0xec   : > { %382 = vst [vmem:[%s208_s23] sm:$0x1] %v381_v20 }
  0xed PF: > { %s12_s11 = sadd.s32 1, %s545_s11   ;;  %s674_s9 = smov %s541_s10 }
  0xee   : > { %p9_p5 = scmp.ge.s32.totalorder %s12_s11, 4   ;;  %s675_s10 = smov %s677_s12 }
  0xf0   :  { %11 = sbr.rel (!%p9_p5) target bundleno = 2 (0x2), region = 61 }

</bundles_post_ra>
